<compile_context>
chip_gen: v5e
topology: v5e:2x2
jax: 0.10.0
libtpu: 0.0.40
codegen_flags: <defaults>
</compile_context>

<pallas_src>
import jax
import jax.numpy as jnp
from jax import lax
from jax.experimental import pallas as pl
from jax.experimental.pallas import tpu as pltpu


def _round_up(x, m):
    return ((x + m - 1) // m) * m


# ---------------------------------------------------------------------------
# Kernels
# ---------------------------------------------------------------------------
def linear_kernel(x_ref, w_ref, b_ref, o_ref):
    # x: (tm, K) f32 (cast in-kernel), w: (K, tn) pre-cast (bf16 or f32),
    # b: (1, tn) f32 -> o: (tm, tn) f32
    x = x_ref[...].astype(w_ref.dtype)
    o_ref[...] = (
        jnp.dot(x, w_ref[...], preferred_element_type=jnp.float32) + b_ref[...]
    )


def lstm_chunk_kernel(gx_ref, whh_ref, c0_ref, len_ref, out_ref, h_sc, c_sc):
    # One grid step == one (batch block, chunk of Tb time steps).
    tchunk = pl.program_id(1)
    Tb = out_ref.shape[0]
    Hp = h_sc.shape[-1]

    @pl.when(tchunk == 0)
    def _():
        h_sc[...] = jnp.zeros_like(h_sc)   # h0 is always zeros in this module
        c_sc[...] = c0_ref[...]

    def sig(x):  # logistic via tanh: 1 EUP op instead of exp + divide
        return 0.5 * jnp.tanh(0.5 * x) + 0.5

    def step(j, carry):
        h_prev, c_prev = carry             # carried in vregs, not VMEM
        # Recurrent matmul: bf16 operands, f32 accumulation.  x-path + biases
        # are already folded into gx.
        gates = (
            jnp.dot(h_prev.astype(whh_ref.dtype), whh_ref[...],
                    preferred_element_type=jnp.float32)
            + gx_ref[j]
        )                                  # (Bb, 4Hp); gate order i, f, g, o
        i_g = sig(gates[:, 0 * Hp:1 * Hp])
        f_g = sig(gates[:, 1 * Hp:2 * Hp])
        g_g = jnp.tanh(gates[:, 2 * Hp:3 * Hp])
        o_g = sig(gates[:, 3 * Hp:4 * Hp])

        c_new = f_g * c_prev + i_g * g_g
        h_new = o_g * jnp.tanh(c_new)
        out_ref[j] = h_new
        return (h_new, c_new)

    h_fin, c_fin = lax.fori_loop(0, Tb, step, (h_sc[...], c_sc[...]), unroll=True)
    h_sc[...] = h_fin                      # scratch written once per chunk
    c_sc[...] = c_fin

    # Zero padded positions (pad_packed_sequence semantics), whole chunk at once.
    t_idx = tchunk * Tb + lax.broadcasted_iota(jnp.int32, (Tb, 1, 1), 0)
    mask = len_ref[...][None, :, :] > t_idx            # (Tb, Bb, 1) bool
    out_ref[...] = jnp.where(mask, out_ref[...], 0.0)


# ---------------------------------------------------------------------------
# Wrappers
# ---------------------------------------------------------------------------
def pallas_linear(x, w_p, b_p, *, tm=512, tn=512):
    """x:(M,K) f32 @ w_p:(K,N) + b_p:(1,N) -> (M,N) f32.

    Weights are pre-transposed / pre-cast / pre-padded (N multiple of 128) at
    prep time; activations stay f32 and are cast in-kernel.  Both grid axes
    are "parallel" (megacore).  Partial edge blocks are handled by Pallas.
    """
    M, K = x.shape
    N = w_p.shape[1]
    tm_eff = min(tm, _round_up(M, 8))
    tn_eff = min(tn, N)
    grid = (pl.cdiv(M, tm_eff), pl.cdiv(N, tn_eff))
    return pl.pallas_call(
        linear_kernel,
        out_shape=jax.ShapeDtypeStruct((M, N), jnp.float32),
        grid=grid,
        in_specs=[
            pl.BlockSpec((tm_eff, K), lambda i, j: (i, 0)),
            pl.BlockSpec((K, tn_eff), lambda i, j: (0, j)),
            pl.BlockSpec((1, tn_eff), lambda i, j: (0, j)),
        ],
        out_specs=pl.BlockSpec((tm_eff, tn_eff), lambda i, j: (i, j)),
        compiler_params=pltpu.CompilerParams(
            dimension_semantics=("parallel", "parallel"),
            vmem_limit_bytes=32 * 1024 * 1024,
        ),
    )(x, w_p, b_p)


def pallas_lstm_layer(gx, w_hh_p, c0_p, lengths_p, *, t_block=16, b_block=None):
    """Recurrent part of one LSTM layer.

    gx:        (T, Bp, 4Hp) f32  -- precomputed x @ W_ih^T + (b_ih + b_hh)
    w_hh_p:    (Hp, 4Hp) bf16    -- pre-transposed / padded recurrent weights
    c0_p:      (Bp, Hp) f32      -- initial cell state (h0 implicitly zeros)
    lengths_p: (Bp, 1) int32
    Returns (T, Bp, Hp) f32 with positions t >= lengths[b] zeroed.
    """
    T, Bp, G = gx.shape
    Hp = c0_p.shape[-1]
    Tb = min(t_block, T)
    if b_block is None:
        # Two batch blocks when batch allows -> megacore shards the recurrence
        # across v7x's two TensorCores; single block otherwise (v5e/v6e no-op).
        b_block = Bp // 2 if Bp >= 16 else Bp
    Bb = b_block
    grid = (Bp // Bb, pl.cdiv(T, Tb))

    return pl.pallas_call(
        lstm_chunk_kernel,
        out_shape=jax.ShapeDtypeStruct((T, Bp, Hp), jnp.float32),
        grid=grid,
        in_specs=[
            pl.BlockSpec((Tb, Bb, G), lambda b, t: (t, b, 0)),
            pl.BlockSpec((Hp, G), lambda b, t: (0, 0)),
            pl.BlockSpec((Bb, Hp), lambda b, t: (b, 0)),
            pl.BlockSpec((Bb, 1), lambda b, t: (b, 0)),
        ],
        out_specs=pl.BlockSpec((Tb, Bb, Hp), lambda b, t: (t, b, 0)),
        scratch_shapes=[
            pltpu.VMEM((Bb, Hp), jnp.float32),   # h carry (across time chunks)
            pltpu.VMEM((Bb, Hp), jnp.float32),   # c carry
        ],
        compiler_params=pltpu.CompilerParams(
            dimension_semantics=("parallel", "arbitrary"),
            vmem_limit_bytes=32 * 1024 * 1024,
        ),
    )(gx, w_hh_p, c0_p, lengths_p)


# ---------------------------------------------------------------------------
# One-time parameter preparation (hoists all transposes / pads / casts)
# ---------------------------------------------------------------------------
def prepare_decoder_params(params, *, matmul_dtype=jnp.bfloat16):
    H, L = params["l2h_w"].shape
    V, E = params["embedding"].shape
    num_layers = len(params["lstm"])
    Hp = _round_up(H, 128)
    Vp = _round_up(V, 128)

    def pad_gate_cols(w_t):
        # (K, 4H) -> (K, 4Hp) with each gate block at a 128-aligned offset.
        K = w_t.shape[0]
        out = jnp.zeros((K, 4 * Hp), w_t.dtype)
        for g in range(4):
            out = out.at[:, g * Hp:g * Hp + H].set(w_t[:, g * H:(g + 1) * H])
        return out

    prepped = {
        "H": H, "Hp": Hp, "V": V, "Vp": Vp, "E": E, "L": L,
        "num_layers": num_layers,
        "embedding": params["embedding"].astype(jnp.float32),
        # latent2hidden kept in f32 (tiny matmul; its output feeds every step).
        "l2h_w": jnp.zeros((L, Hp), jnp.float32).at[:, :H].set(params["l2h_w"].T),
        "l2h_b": jnp.zeros((1, Hp), jnp.float32).at[:, :H].set(params["l2h_b"]),
        "out_w": jnp.zeros((Hp, Vp), matmul_dtype).at[:H, :V].set(
            params["out_w"].T.astype(matmul_dtype)),
        "out_b": jnp.zeros((1, Vp), jnp.float32).at[:, :V].set(params["out_b"]),
        "lstm": [],
    }
    for l in range(num_layers):
        w_ih, w_hh, b_ih, b_hh = params["lstm"][l]
        in_dim = w_ih.shape[1]
        in_dim_p = in_dim if l == 0 else Hp      # layers > 0 receive Hp-padded h
        w_ih_t = jnp.zeros((in_dim_p, 4 * H), jnp.float32).at[:in_dim].set(w_ih.T)
        w_hh_t = jnp.zeros((Hp, 4 * H), jnp.float32).at[:H].set(w_hh.T)
        w_ih_p = pad_gate_cols(w_ih_t).astype(matmul_dtype)
        w_hh_p = pad_gate_cols(w_hh_t).astype(matmul_dtype)
        b_p = pad_gate_cols((b_ih + b_hh)[None, :]).astype(jnp.float32)
        prepped["lstm"].append((w_ih_p, w_hh_p, b_p))
    return prepped


# ---------------------------------------------------------------------------
# Forward pass (mirrors Decoder.forward(x, lengths, states, is_latent_states=True))
# ---------------------------------------------------------------------------
def decoder_forward(prepped, x_tokens, lengths, latent_states, *, t_block=16):
    B, T = x_tokens.shape
    H, Hp, V, Vp = prepped["H"], prepped["Hp"], prepped["V"], prepped["Vp"]
    num_layers = prepped["num_layers"]

    # Pad batch ONCE at the input boundary (tokens / lengths / latent) so all
    # downstream activations are sublane-aligned without further copies.
    Bp = _round_up(B, 8) if B <= 8 else _round_up(B, 16)
    pad_b = Bp - B
    tok_p = jnp.pad(x_tokens, ((0, pad_b), (0, 0)))
    len_p = jnp.pad(lengths.astype(jnp.int32), (0, pad_b))[:, None]       # (Bp,1)
    lat_p = jnp.pad(latent_states.astype(jnp.float32), ((0, pad_b), (0, 0)))

    # --- is_latent_states branch: c0 = latent2hidden(states) (f32) ----------
    c0_p = pallas_linear(lat_p, prepped["l2h_w"], prepped["l2h_b"])       # (Bp,Hp)

    # --- embedding lookup, directly time-major (no activation transpose) ----
    emb = prepped["embedding"][tok_p.T]                                   # (T,Bp,E)

    # --- LSTM over packed sequence (zero-masked padding) ---------------------
    layer_in = emb
    for l in range(num_layers):
        w_ih_p, w_hh_p, b_p = prepped["lstm"][l]
        in_dim = layer_in.shape[-1]
        # Input-gate contribution for ALL time steps in one parallel matmul.
        gx = pallas_linear(layer_in.reshape(T * Bp, in_dim), w_ih_p, b_p)
        gx = gx.reshape(T, Bp, 4 * Hp)
        layer_in = pallas_lstm_layer(gx, w_hh_p, c0_p, len_p, t_block=t_block)
        # TODO(synk): nn.LSTM inter-layer dropout is train-only; eval -> no-op.

    # --- output projection on time-major rows (avoids the big transpose) ----
    logits_tm = pallas_linear(layer_in.reshape(T * Bp, Hp),
                              prepped["out_w"], prepped["out_b"])
    logits = jnp.transpose(logits_tm.reshape(T, Bp, Vp)[:, :B, :V], (1, 0, 2))

    c0 = jnp.broadcast_to(c0_p[:B, :H][None], (num_layers, B, H))
    h0 = jnp.zeros_like(c0)
    return logits, lengths, (h0, c0)


# ---------------------------------------------------------------------------
# Deterministic parameter init + example run
# ---------------------------------------------------------------------------
def init_params(key, vocab, embed_dim, hidden, num_layers, latent):
    ks = jax.random.split(key, 6 + 4 * num_layers)
    s = 0.1
    params = {
        "embedding": s * jax.random.normal(ks[0], (vocab, embed_dim), jnp.float32),
        "l2h_w": s * jax.random.normal(ks[1], (hidden, latent), jnp.float32),
        "l2h_b": s * jax.random.normal(ks[2], (hidden,), jnp.float32),
        "out_w": s * jax.random.normal(ks[3], (vocab, hidden), jnp.float32),
        "out_b": s * jax.random.normal(ks[4], (vocab,), jnp.float32),
        "lstm": [],
    }
    for l in range(num_layers):
        in_dim = embed_dim if l == 0 else hidden
        k0, k1, k2, k3 = ks[6 + 4 * l: 10 + 4 * l]
        params["lstm"].append((
            s * jax.random.normal(k0, (4 * hidden, in_dim), jnp.float32),
            s * jax.random.normal(k1, (4 * hidden, hidden), jnp.float32),
            s * jax.random.normal(k2, (4 * hidden,), jnp.float32),
            s * jax.random.normal(k3, (4 * hidden,), jnp.float32),
        ))
    return params


if __name__ == "__main__":
    B, T = 2, 8
    VOCAB, EMBED, HIDDEN, LATENT, NUM_LAYERS = 12, 16, 32, 8, 2

    key = jax.random.PRNGKey(0)
    k_par, k_tok, k_lat = jax.random.split(key, 3)

    params = init_params(k_par, VOCAB, EMBED, HIDDEN, NUM_LAYERS, LATENT)
    prepped = prepare_decoder_params(params)     # one-time weight prep (hoisted)

    x_tokens = jax.random.randint(k_tok, (B, T), 0, VOCAB, jnp.int32)
    lengths = jnp.array([8, 5], dtype=jnp.int32)  # sorted desc (enforce_sorted)
    latent_states = jax.random.normal(k_lat, (B, LATENT), jnp.float32)

    logits, out_lengths, (h0, c0) = decoder_forward(
        prepped, x_tokens, lengths, latent_states
    )
    jax.block_until_ready((logits, out_lengths, h0, c0))

    assert logits.shape == (B, T, VOCAB)
    assert h0.shape == (NUM_LAYERS, B, HIDDEN) and c0.shape == (NUM_LAYERS, B, HIDDEN)
    assert bool(jnp.all(jnp.isfinite(logits)))
    print("KERNEL_OK")
</pallas_src>

<mosaic_0001>
module attributes {stable_mosaic.version = 11 : i64} {
  func.func @linear_kernel(%arg0: i32, %arg1: i32, %arg2: memref<8x8xf32, #tpu.memory_space<vmem>>, %arg3: memref<8x128xf32, #tpu.memory_space<vmem>>, %arg4: memref<1x128xf32, #tpu.memory_space<vmem>>, %arg5: memref<8x128xf32, #tpu.memory_space<vmem>>) attributes {dimension_semantics = [#tpu.dimension_semantics<parallel>, #tpu.dimension_semantics<parallel>], iteration_bounds = array<i64: 1, 1>, scalar_prefetch = 0 : i64, scratch_operands = 0 : i64, tpu.core_type = #tpu.core_type<tc>, window_params = [{transform_indices = @transform_0, window_bounds = array<i64: 8, 8>}, {transform_indices = @transform_1, window_bounds = array<i64: 8, 128>}, {transform_indices = @transform_2, window_bounds = array<i64: 1, 128>}, {transform_indices = @transform_3, window_bounds = array<i64: 8, 128>}]} {
    %c0 = arith.constant 0 : index
    %c0_0 = arith.constant 0 : index
    %0 = vector.load %arg2[%c0, %c0_0] : memref<8x8xf32, #tpu.memory_space<vmem>>, vector<8x8xf32>
    %c0_1 = arith.constant 0 : index
    %c0_2 = arith.constant 0 : index
    %1 = vector.load %arg3[%c0_1, %c0_2] : memref<8x128xf32, #tpu.memory_space<vmem>>, vector<8x128xf32>
    %cst = arith.constant dense<0.000000e+00> : vector<8x128xf32>
    %2 = tpu.matmul %0, %1, %cst {dimension_numbers = #tpu.dot_dimension_numbers<[1], [0], [0], [1], [0, 0, 1, 1], [], []>} : vector<8x8xf32>, vector<8x128xf32>, vector<8x128xf32> -> vector<8x128xf32>
    %c0_3 = arith.constant 0 : index
    %c0_4 = arith.constant 0 : index
    %3 = vector.load %arg4[%c0_3, %c0_4] : memref<1x128xf32, #tpu.memory_space<vmem>>, vector<1x128xf32>
    %4 = vector.broadcast %3 : vector<1x128xf32> to vector<8x128xf32>
    %5 = arith.addf %2, %4 : vector<8x128xf32>
    %c0_5 = arith.constant 0 : index
    %c0_6 = arith.constant 0 : index
    %6 = vector.load %arg5[%c0_5, %c0_6] : memref<8x128xf32, #tpu.memory_space<vmem>>, vector<8x128xf32>
    tpu.vector_store %arg5[%c0_5, %c0_6], %5 {strides = array<i32>} : memref<8x128xf32, #tpu.memory_space<vmem>>, vector<8x128xf32>,
    return
  }
  func.func @transform_0(%arg0: i32, %arg1: i32) -> (i32, i32) {
    %c0_i32 = arith.constant 0 : i32
    %c0_i32_0 = arith.constant 0 : i32
    return %arg0, %c0_i32 : i32, i32
  }
  func.func @transform_1(%arg0: i32, %arg1: i32) -> (i32, i32) {
    %c0_i32 = arith.constant 0 : i32
    %c0_i32_0 = arith.constant 0 : i32
    return %c0_i32, %arg1 : i32, i32
  }
  func.func @transform_2(%arg0: i32, %arg1: i32) -> (i32, i32) {
    %c0_i32 = arith.constant 0 : i32
    %c0_i32_0 = arith.constant 0 : i32
    return %c0_i32, %arg1 : i32, i32
  }
  func.func @transform_3(%arg0: i32, %arg1: i32) -> (i32, i32) {
    %c0_i32 = arith.constant 0 : i32
    return %arg0, %arg1 : i32, i32
  }
}

</mosaic_0001>

<bundles_post_ra>
// kernel: tpu_custom_call.1
= control target key start
LH: loop header
LB: loop body
LE: loop exit
PB: predicated region body
PF: predicated region fallthrough
CT: control target
= control target key end

     0   :  { %8 = vsyncpa [#allocation3], 0  ;;  %s210_s0 = inlined_call_operand.hbm [shape: f32[8,8], index: 0, kind: input, shape index: {}]   ;;  %s211_s1 = inlined_call_operand.hbm [shape: f32[8,128], index: 1, kind: input, shape index: {}]   ;;  %s212_s2 = inlined_call_operand.vmem [shape: f32[1,128], index: 2, kind: input, shape index: {}]   ;;  %s213_s3 = inlined_call_operand.hbm [shape: f32[8,128], index: 3, kind: output, shape index: {}]  }
   0x1   :  { %9 = vsyncpa [#allocation6], 0 }
   0x2   :  { %10 = vsyncpa [#allocation4], 0  ;;  %s16_s14 = sshll.u32 %s210_s0, 4  ;;  %s175_s15 = smov [#allocation2]   ;;  %s17_s14 = int_to_ptr.hbm [resolvable:$true] %s16_s14 }
   0x3   :  { %s18_s16 = sshll.u32 %s175_s15, 4  ;;  %s27_s19 = sshll.u32 %s211_s1, 4  ;;  %s19_s16 = int_to_ptr.vmem [resolvable:$true] %s18_s16  ;;  %s28_s19 = int_to_ptr.hbm [resolvable:$true] %s27_s19 }
   0x4   :  { %21 = dma.hbm_to_vmem [thread:$0]  %s17_s14, 128, %s19_s16, [#allocation3]  }
   0x5   :  { %s176_s20 = smov [#allocation5]  }
   0x6   :  { %s29_s21 = sshll.u32 %s176_s20, 4  ;;  %s30_s21 = int_to_ptr.vmem [resolvable:$true] %s29_s21 }
   0x7   :  { %32 = dma.hbm_to_vmem [thread:$0]  %s28_s19, 128, %s30_s21, [#allocation6]  }
   0x8   :  { %169 = dma.done.wait [#allocation3], 128  }
   0x9   :  { %170 = vsyncadd [#allocation3], 4294967168 }
   0xa   :  { %171 = dma.done.wait [#allocation6], 128  }
   0xb   :  { %172 = vsyncadd [#allocation6], 4294967168  ;;  %vm49_vm0 = vcmask 64512   ;;  %v44_v0 = vld [vmem:[#allocation5] sm:$0xff]  ;;  %v43_v1 = vld [vmem:[#allocation2] sm:$0xff]  ;;  %s177_s1 = smov [#allocation7]  }
   0xc   :  { %68 = vmatpush.msra.mxu0 %v44_v0  ;;  %v96_v2 = vld [vmem:[%s212_s2] ss:$0 sm:$0xff]  ;;  %s79_s23 = sshll.u32 %s177_s1, 4  ;;  %s81_s26 = sshll.u32 %s213_s3, 4  ;;  %s80_s23 = int_to_ptr.vmem [resolvable:$true] %s79_s23  ;;  %s82_s26 = int_to_ptr.hbm [resolvable:$true] %s81_s26 }
   0xd   :  { %92 = vmatmul.msk.f32.vlgmr.msra.gmra.mxu0 %vm49_vm0, %v43_v1 }
  0x8a   :  { %v70_v3 = vpop.f32.mrf.mxu0 }
  0x8b   :  { %v71_v4 = vadd.f32 %v96_v2, %v70_v3 }
  0x8d   :  { %73 = vst [vmem:[#allocation7] sm:$0xff] %v71_v4 }
  0x8e   :  { %84 = dma.vmem_to_hbm [thread:$0]  %s80_s23, 128, %s82_s26, [#allocation4]  }
  0x8f   :  { %173 = dma.done.wait [#allocation4], 128  }
  0x90   :  { %174 = vsyncadd [#allocation4], 4294967168 }
  0x91   :  { %89 = vsyncpa [#allocation3], 1 }
  0x92   :  { %90 = vsyncpa [#allocation6], 1 }
  0x93   :  { %91 = vsyncpa [#allocation4], 1 }

</bundles_post_ra>
